<compile_context>
chip_gen: v5e
topology: v5e:2x2
jax: 0.10.0
libtpu: 0.0.40
codegen_flags: <defaults>
</compile_context>

<pallas_src>
import functools

import jax
import jax.numpy as jnp
from jax.experimental import pallas as pl
from jax.experimental.pallas import tpu as pltpu


def _nll_loss_kernel(x_ref, t_ref, logsum_ref, probsum_ref,
                     acc_log_ref, acc_prob_ref,
                     *, tb: int, batch: int, inner_tiles: int):
    c = pl.program_id(0)          # megacore split axis ("parallel")
    i = pl.program_id(1)          # batch-tile axis ("arbitrary", resident acc)
    n = pl.num_programs(1)

    @pl.when(i == 0)
    def _init():
        acc_log_ref[...] = jnp.zeros_like(acc_log_ref)
        acc_prob_ref[...] = jnp.zeros_like(acc_prob_ref)

    x = x_ref[...].astype(jnp.float32)          # (TB, L) logits
    t = t_ref[...].astype(jnp.float32)          # (TB, L) multi-hot targets

    # Stable softmax pieces, never materializing probs:
    #   sumprobs_row = sum(t * softmax(x)) = sum(t * e) / sum(e)
    m = jnp.max(x, axis=1, keepdims=True)                       # (TB, 1)
    e = jnp.exp(x - m)                                          # (TB, L) only per-element EUP op
    sum_e = jnp.sum(e, axis=1, keepdims=True)                   # (TB, 1)
    sum_te = jnp.sum(t * e, axis=1, keepdims=True)              # (TB, 1)

    sumprobs = sum_te / sum_e                                   # (TB, 1) one divide per row
    logprobs = jnp.log(sumprobs)                                # (TB, 1) one log per row

    # Mask rows that lie past the real batch (ragged last tile and any
    # duplicated tile from the megacore split).  Garbage rows in the
    # out-of-bounds part of the last block never cross rows above (all ops are
    # per-row), and jnp.where drops any NaN/Inf they produced.
    g = c * inner_tiles + i                                     # global tile index (unclamped)
    row = jax.lax.broadcasted_iota(jnp.int32, (tb, 1), 0) + g * tb
    valid = row < batch
    acc_log_ref[...] += jnp.where(valid, logprobs, 0.0)         # (TB, 1) sublane partials
    acc_prob_ref[...] += jnp.where(valid, sumprobs, 0.0)

    @pl.when(i == n - 1)
    def _finalize():
        # Single cross-sublane reduce per core, only at the end.
        logsum_ref[...] = jnp.sum(acc_log_ref[...]).reshape(1, 1, 1)
        probsum_ref[...] = jnp.sum(acc_prob_ref[...]).reshape(1, 1, 1)


def _sublane_multiple(dtype) -> int:
    # f32 -> 8, bf16/f16 -> 16, int8/fp8 -> 32 (packed sublane granularity).
    return {4: 8, 2: 16, 1: 32}.get(jnp.dtype(dtype).itemsize, 8)


def _vmem_limits() -> tuple[int, int]:
    """Returns (tile_budget_bytes, vmem_limit_bytes), generation-aware."""
    try:
        cap = int(pltpu.get_tpu_info().vmem_capacity_bytes)
    except Exception:
        cap = 64 * 1024 * 1024          # safe fallback on all generations
    # Leave headroom for compiler-internal scratch; never exceed 96 MiB.
    limit = max(32 * 1024 * 1024, min((cap * 3) // 4, 96 * 1024 * 1024))
    budget = (limit * 3) // 5           # share of limit used for tile sizing
    return budget, limit


def _pick_tile_rows(batch: int, labels: int, in_dtype, t_dtype,
                    budget_bytes: int) -> int:
    in_sz = jnp.dtype(in_dtype).itemsize
    t_sz = jnp.dtype(t_dtype).itemsize
    # 2x pipeline buffers per input stream + f32 temporaries (x, t, e, t*e).
    per_row = labels * (2 * in_sz + 2 * t_sz + 4 * 4)
    cap = max(budget_bytes // max(per_row, 1), 1)
    if cap >= batch:
        return batch                    # single tile == full batch (always legal)
    mult = max(_sublane_multiple(in_dtype), _sublane_multiple(t_dtype))
    return max(mult, (cap // mult) * mult)


def nll_loss(inputs, targets, *, tile_rows: int | None = None,
             compact_targets: bool = True):
    """Returns (loss, total_probs), matching the PyTorch nll_loss.forward."""
    B, L = inputs.shape
    assert targets.shape == (B, L)

    # bf16 is exact for {0,1} multi-hot targets and halves their HBM stream.
    if compact_targets and targets.dtype == jnp.float32:
        targets = targets.astype(jnp.bfloat16)

    budget, vmem_limit = _vmem_limits()
    mult = max(_sublane_multiple(inputs.dtype), _sublane_multiple(targets.dtype))
    if tile_rows is None:
        tb = _pick_tile_rows(B, L, inputs.dtype, targets.dtype, budget)
    else:
        tb = B if tile_rows >= B else max(mult, (tile_rows // mult) * mult)

    total_tiles = pl.cdiv(B, tb)
    splits = 2 if total_tiles >= 2 else 1        # use both TCs on v7x
    inner_tiles = pl.cdiv(total_tiles, splits)

    def in_map(c, i):
        # Clamp so a duplicated tile (odd tile count split across 2 cores)
        # still reads a valid block; its rows are masked in-kernel anyway.
        return (jnp.minimum(c * inner_tiles + i, total_tiles - 1), 0)

    kernel = functools.partial(_nll_loss_kernel, tb=tb, batch=B,
                               inner_tiles=inner_tiles)

    bytes_in = B * L * (jnp.dtype(inputs.dtype).itemsize
                        + jnp.dtype(targets.dtype).itemsize)
    cost = pl.CostEstimate(
        flops=6 * B * L,
        transcendentals=B * L + 2 * B,
        bytes_accessed=bytes_in + splits * 8,
    )

    logsum, probsum = pl.pallas_call(
        kernel,
        out_shape=(
            jax.ShapeDtypeStruct((splits, 1, 1), jnp.float32),
            jax.ShapeDtypeStruct((splits, 1, 1), jnp.float32),
        ),
        grid_spec=pltpu.PrefetchScalarGridSpec(
            num_scalar_prefetch=0,
            grid=(splits, inner_tiles),
            in_specs=[
                pl.BlockSpec((tb, L), in_map),
                pl.BlockSpec((tb, L), in_map),
            ],
            out_specs=[
                pl.BlockSpec((1, 1, 1), lambda c, i: (c, 0, 0)),
                pl.BlockSpec((1, 1, 1), lambda c, i: (c, 0, 0)),
            ],
            scratch_shapes=[
                pltpu.VMEM((tb, 1), jnp.float32),   # running per-row log partials
                pltpu.VMEM((tb, 1), jnp.float32),   # running per-row prob partials
            ],
        ),
        compiler_params=pltpu.CompilerParams(
            dimension_semantics=("parallel", "arbitrary"),
            vmem_limit_bytes=vmem_limit,
        ),
        cost_estimate=cost,
    )(inputs, targets)

    # Trivial per-core partial reduction + final scaling in the wrapper.
    loss = -(jnp.sum(logsum) / jnp.float32(B))
    total = jnp.sum(probsum)
    return loss, total


def _reference(inputs, targets):
    sm = jax.nn.softmax(inputs.astype(jnp.float32), axis=1)
    sp = jnp.sum(targets.astype(jnp.float32) * sm, axis=1)
    return -jnp.mean(jnp.log(sp)), jnp.sum(sp)


if __name__ == "__main__":
    key = jax.random.PRNGKey(0)
    k1, k2, k3, k4 = jax.random.split(key, 4)

    # Case 1: small aligned shape (batch=8, label_num=128), single full-batch tile.
    B, L = 8, 128
    inputs = jax.random.normal(k1, (B, L), dtype=jnp.float32)
    targets = (jax.random.uniform(k2, (B, L)) < 0.25).astype(jnp.float32)
    targets = targets.at[:, 0].set(1.0)   # ensure every row has a positive label

    loss, total = nll_loss(inputs, targets)
    jax.block_until_ready(loss)
    ref_loss, ref_total = _reference(inputs, targets)
    assert jnp.allclose(loss, ref_loss, rtol=1e-5, atol=1e-5), (loss, ref_loss)
    assert jnp.allclose(total, ref_total, rtol=1e-5, atol=1e-5), (total, ref_total)

    # Case 2: batch not a multiple of the tile -> exercises the ragged last
    # block (no padding), the megacore split axis and multi-tile accumulation.
    B2, L2 = 20, 256
    inputs2 = jax.random.normal(k3, (B2, L2), dtype=jnp.float32)
    targets2 = (jax.random.uniform(k4, (B2, L2)) < 0.1).astype(jnp.float32)
    targets2 = targets2.at[:, 0].set(1.0)

    loss2, total2 = nll_loss(inputs2, targets2, tile_rows=16)
    jax.block_until_ready(loss2)
    ref_loss2, ref_total2 = _reference(inputs2, targets2)
    assert jnp.allclose(loss2, ref_loss2, rtol=1e-5, atol=1e-5), (loss2, ref_loss2)
    assert jnp.allclose(total2, ref_total2, rtol=1e-5, atol=1e-5), (total2, ref_total2)

    # Case 3: same ragged batch with the automatic tile heuristic (single
    # full-batch tile, block == full dims, no mask needed but still correct).
    loss3, total3 = nll_loss(inputs2, targets2)
    jax.block_until_ready(loss3)
    assert jnp.allclose(loss3, ref_loss2, rtol=1e-5, atol=1e-5), (loss3, ref_loss2)
    assert jnp.allclose(total3, ref_total2, rtol=1e-5, atol=1e-5), (total3, ref_total2)

    print("KERNEL_OK")
</pallas_src>

<mosaic_0001>
module attributes {stable_mosaic.version = 11 : i64} {
  func.func @_nll_loss_kernel(%arg0: i32, %arg1: i32, %arg2: memref<8x128xf32, #tpu.memory_space<vmem>>, %arg3: memref<8x128xbf16, #tpu.memory_space<vmem>>, %arg4: memref<1x1x1xf32, #tpu.memory_space<vmem>>, %arg5: memref<1x1x1xf32, #tpu.memory_space<vmem>>, %arg6: memref<8x1xf32, #tpu.memory_space<vmem>>, %arg7: memref<8x1xf32, #tpu.memory_space<vmem>>) attributes {dimension_semantics = [#tpu.dimension_semantics<parallel>, #tpu.dimension_semantics<arbitrary>], iteration_bounds = array<i64: 1, 1>, scalar_prefetch = 0 : i64, scratch_operands = 2 : i64, tpu.core_type = #tpu.core_type<tc>, window_params = [{transform_indices = @transform_0, window_bounds = array<i64: 8, 128>}, {transform_indices = @transform_1, window_bounds = array<i64: 8, 128>}, {transform_indices = @transform_2, window_bounds = array<i64: 1, 1, 1>}, {transform_indices = @transform_3, window_bounds = array<i64: 1, 1, 1>}]} {
    %c0_i32 = arith.constant 0 : i32
    %0 = arith.cmpi eq, %arg1, %c0_i32 : i32
    %1 = arith.extui %0 : i1 to i32
    %c0_i32_0 = arith.constant 0 : i32
    %2 = arith.cmpi ne, %1, %c0_i32_0 : i32
    scf.if %2 {
      %cst_19 = arith.constant 0.000000e+00 : f32
      %39 = vector.broadcast %cst_19 : f32 to vector<8x1xf32>
      %c0_20 = arith.constant 0 : index
      %c0_21 = arith.constant 0 : index
      %40 = vector.load %arg6[%c0_20, %c0_21] : memref<8x1xf32, #tpu.memory_space<vmem>>, vector<8x1xf32>
      tpu.vector_store %arg6[%c0_20, %c0_21], %39 {strides = array<i32>} : memref<8x1xf32, #tpu.memory_space<vmem>>, vector<8x1xf32>,
      %cst_22 = arith.constant 0.000000e+00 : f32
      %41 = vector.broadcast %cst_22 : f32 to vector<8x1xf32>
      %c0_23 = arith.constant 0 : index
      %c0_24 = arith.constant 0 : index
      %42 = vector.load %arg7[%c0_23, %c0_24] : memref<8x1xf32, #tpu.memory_space<vmem>>, vector<8x1xf32>
      tpu.vector_store %arg7[%c0_23, %c0_24], %41 {strides = array<i32>} : memref<8x1xf32, #tpu.memory_space<vmem>>, vector<8x1xf32>,
    } else {
    }
    %c0 = arith.constant 0 : index
    %c0_1 = arith.constant 0 : index
    %3 = vector.load %arg2[%c0, %c0_1] : memref<8x128xf32, #tpu.memory_space<vmem>>, vector<8x128xf32>
    %c0_2 = arith.constant 0 : index
    %c0_3 = arith.constant 0 : index
    %4 = vector.load %arg3[%c0_2, %c0_3] : memref<8x128xbf16, #tpu.memory_space<vmem>>, vector<8x128xbf16>
    %5 = arith.extf %4 : vector<8x128xbf16> to vector<8x128xf32>
    %cst = arith.constant dense<0xFF800000> : vector<8xf32>
    %6 = vector.multi_reduction <maximumf>, %3, %cst [1] : vector<8x128xf32> to vector<8xf32>
    %7 = vector.shape_cast %6 : vector<8xf32> to vector<8x1xf32>
    %8 = vector.broadcast %7 : vector<8x1xf32> to vector<8x128xf32>
    %9 = arith.subf %3, %8 : vector<8x128xf32>
    %10 = math.exp %9 : vector<8x128xf32>
    %cst_4 = arith.constant dense<0.000000e+00> : vector<8xf32>
    %11 = vector.multi_reduction <add>, %10, %cst_4 [1] : vector<8x128xf32> to vector<8xf32>
    %12 = vector.shape_cast %11 : vector<8xf32> to vector<8x1xf32>
    %13 = arith.mulf %5, %10 : vector<8x128xf32>
    %cst_5 = arith.constant dense<0.000000e+00> : vector<8xf32>
    %14 = vector.multi_reduction <add>, %13, %cst_5 [1] : vector<8x128xf32> to vector<8xf32>
    %15 = vector.shape_cast %14 : vector<8xf32> to vector<8x1xf32>
    %16 = arith.divf %15, %12 : vector<8x1xf32>
    %17 = math.log %16 : vector<8x1xf32>
    %c1_i32 = arith.constant 1 : i32
    %18 = arith.muli %arg0, %c1_i32 : i32
    %19 = arith.addi %18, %arg1 : i32
    %20 = tpu.iota {dimensions = array<i32: 0>} : vector<8x1xi32>
    %c8_i32 = arith.constant 8 : i32
    %21 = arith.muli %19, %c8_i32 : i32
    %22 = vector.broadcast %21 : i32 to vector<8x1xi32>
    %23 = arith.addi %20, %22 : vector<8x1xi32>
    %c8_i32_6 = arith.constant 8 : i32
    %24 = vector.broadcast %c8_i32_6 : i32 to vector<8x1xi32>
    %25 = arith.cmpi slt, %23, %24 : vector<8x1xi32>
    %c0_7 = arith.constant 0 : index
    %c0_8 = arith.constant 0 : index
    %26 = vector.load %arg6[%c0_7, %c0_8] : memref<8x1xf32, #tpu.memory_space<vmem>>, vector<8x1xf32>
    %cst_9 = arith.constant 0.000000e+00 : f32
    %27 = vector.broadcast %cst_9 : f32 to vector<8x1xf32>
    %28 = arith.select %25, %17, %27 : vector<8x1xi1>, vector<8x1xf32>
    %29 = arith.addf %26, %28 : vector<8x1xf32>
    %c0_10 = arith.constant 0 : index
    %c0_11 = arith.constant 0 : index
    %30 = vector.load %arg6[%c0_10, %c0_11] : memref<8x1xf32, #tpu.memory_space<vmem>>, vector<8x1xf32>
    tpu.vector_store %arg6[%c0_10, %c0_11], %29 {strides = array<i32>} : memref<8x1xf32, #tpu.memory_space<vmem>>, vector<8x1xf32>,
    %c0_12 = arith.constant 0 : index
    %c0_13 = arith.constant 0 : index
    %31 = vector.load %arg7[%c0_12, %c0_13] : memref<8x1xf32, #tpu.memory_space<vmem>>, vector<8x1xf32>
    %cst_14 = arith.constant 0.000000e+00 : f32
    %32 = vector.broadcast %cst_14 : f32 to vector<8x1xf32>
    %33 = arith.select %25, %16, %32 : vector<8x1xi1>, vector<8x1xf32>
    %34 = arith.addf %31, %33 : vector<8x1xf32>
    %c0_15 = arith.constant 0 : index
    %c0_16 = arith.constant 0 : index
    %35 = vector.load %arg7[%c0_15, %c0_16] : memref<8x1xf32, #tpu.memory_space<vmem>>, vector<8x1xf32>
    tpu.vector_store %arg7[%c0_15, %c0_16], %34 {strides = array<i32>} : memref<8x1xf32, #tpu.memory_space<vmem>>, vector<8x1xf32>,
    %c0_i32_17 = arith.constant 0 : i32
    %36 = arith.cmpi eq, %arg1, %c0_i32_17 : i32
    %37 = arith.extui %36 : i1 to i32
    %c0_i32_18 = arith.constant 0 : i32
    %38 = arith.cmpi ne, %37, %c0_i32_18 : i32
    scf.if %38 {
      %c0_19 = arith.constant 0 : index
      %c0_20 = arith.constant 0 : index
      %39 = vector.load %arg6[%c0_19, %c0_20] : memref<8x1xf32, #tpu.memory_space<vmem>>, vector<8x1xf32>
      %40 = vector.shape_cast %39 : vector<8x1xf32> to vector<1x8x1xf32>
      %cst_21 = arith.constant dense<0.000000e+00> : vector<1xf32>
      %41 = vector.multi_reduction <add>, %40, %cst_21 [1, 2] : vector<1x8x1xf32> to vector<1xf32>
      %42 = vector.shape_cast %41 : vector<1xf32> to vector<1x1x1xf32>
      %43 = vector.extract %42[0, 0, 0] : f32 from vector<1x1x1xf32>
      %44 = vector.broadcast %43 : f32 to vector<1x1x1xf32>
      %c0_22 = arith.constant 0 : index
      %c0_23 = arith.constant 0 : index
      %c0_24 = arith.constant 0 : index
      %45 = vector.load %arg4[%c0_22, %c0_23, %c0_24] : memref<1x1x1xf32, #tpu.memory_space<vmem>>, vector<1x1x1xf32>
      tpu.vector_store %arg4[%c0_22, %c0_23, %c0_24], %44 {strides = array<i32>} : memref<1x1x1xf32, #tpu.memory_space<vmem>>, vector<1x1x1xf32>,
      %c0_25 = arith.constant 0 : index
      %c0_26 = arith.constant 0 : index
      %46 = vector.load %arg7[%c0_25, %c0_26] : memref<8x1xf32, #tpu.memory_space<vmem>>, vector<8x1xf32>
      %47 = vector.shape_cast %46 : vector<8x1xf32> to vector<1x8x1xf32>
      %cst_27 = arith.constant dense<0.000000e+00> : vector<1xf32>
      %48 = vector.multi_reduction <add>, %47, %cst_27 [1, 2] : vector<1x8x1xf32> to vector<1xf32>
      %49 = vector.shape_cast %48 : vector<1xf32> to vector<1x1x1xf32>
      %50 = vector.extract %49[0, 0, 0] : f32 from vector<1x1x1xf32>
      %51 = vector.broadcast %50 : f32 to vector<1x1x1xf32>
      %c0_28 = arith.constant 0 : index
      %c0_29 = arith.constant 0 : index
      %c0_30 = arith.constant 0 : index
      %52 = vector.load %arg5[%c0_28, %c0_29, %c0_30] : memref<1x1x1xf32, #tpu.memory_space<vmem>>, vector<1x1x1xf32>
      tpu.vector_store %arg5[%c0_28, %c0_29, %c0_30], %51 {strides = array<i32>} : memref<1x1x1xf32, #tpu.memory_space<vmem>>, vector<1x1x1xf32>,
    } else {
    }
    return
  }
  func.func @transform_0(%arg0: i32, %arg1: i32) -> (i32, i32) {
    %c1_i32 = arith.constant 1 : i32
    %0 = arith.muli %arg0, %c1_i32 : i32
    %1 = arith.addi %0, %arg1 : i32
    %c0_i32 = arith.constant 0 : i32
    %2 = arith.minsi %1, %c0_i32 : i32
    %c0_i32_0 = arith.constant 0 : i32
    %c0_i32_1 = arith.constant 0 : i32
    return %2, %c0_i32_0 : i32, i32
  }
  func.func @transform_1(%arg0: i32, %arg1: i32) -> (i32, i32) {
    %c1_i32 = arith.constant 1 : i32
    %0 = arith.muli %arg0, %c1_i32 : i32
    %1 = arith.addi %0, %arg1 : i32
    %c0_i32 = arith.constant 0 : i32
    %2 = arith.minsi %1, %c0_i32 : i32
    %c0_i32_0 = arith.constant 0 : i32
    %c0_i32_1 = arith.constant 0 : i32
    return %2, %c0_i32_0 : i32, i32
  }
  func.func @transform_2(%arg0: i32, %arg1: i32) -> (i32, i32, i32) {
    %c0_i32 = arith.constant 0 : i32
    %c0_i32_0 = arith.constant 0 : i32
    %c0_i32_1 = arith.constant 0 : i32
    return %arg0, %c0_i32, %c0_i32_0 : i32, i32, i32
  }
  func.func @transform_3(%arg0: i32, %arg1: i32) -> (i32, i32, i32) {
    %c0_i32 = arith.constant 0 : i32
    %c0_i32_0 = arith.constant 0 : i32
    %c0_i32_1 = arith.constant 0 : i32
    return %arg0, %c0_i32, %c0_i32_0 : i32, i32, i32
  }
}

</mosaic_0001>

<bundles_post_ra>
// kernel: tpu_custom_call.1
= control target key start
LH: loop header
LB: loop body
LE: loop exit
PB: predicated region body
PF: predicated region fallthrough
CT: control target
= control target key end

     0   :  { %9 = vsyncpa [#allocation5], 0  ;;  %s342_s0 = inlined_call_operand.hbm [shape: f32[8,128], index: 0, kind: input, shape index: {}]   ;;  %s343_s1 = inlined_call_operand.hbm [shape: bf16[8,128], index: 1, kind: input, shape index: {}]   ;;  %s344_s2 = inlined_call_operand.hbm [shape: f32[1,1,1], index: 2, kind: output, shape index: {0}]   ;;  %s345_s3 = inlined_call_operand.hbm [shape: f32[1,1,1], index: 3, kind: output, shape index: {1}]  }
   0x1   :  { %10 = vsyncpa [#allocation8], 0 }
   0x2   :  { %11 = vsyncpa [#allocation6], 0 }
   0x3   :  { %12 = vsyncpa [#allocation11], 0  ;;  %s23_s14 = sshll.u32 %s342_s0, 4  ;;  %s299_s15 = smov [#allocation4]   ;;  %s24_s14 = int_to_ptr.hbm [resolvable:$true] %s23_s14 }
   0x4   :  { %s25_s16 = sshll.u32 %s299_s15, 4  ;;  %s39_s19 = sshll.u32 %s343_s1, 4  ;;  %s26_s16 = int_to_ptr.vmem [resolvable:$true] %s25_s16  ;;  %s40_s19 = int_to_ptr.hbm [resolvable:$true] %s39_s19 }
   0x5   :  { %28 = dma.hbm_to_vmem [thread:$0]  %s24_s14, 128, %s26_s16, [#allocation5]  }
   0x6   :  { %s300_s20 = smov [#allocation7]  }
   0x7   :  { %s41_s21 = sshll.u32 %s300_s20, 4  ;;  %s42_s21 = int_to_ptr.vmem [resolvable:$true] %s41_s21 }
   0x8   :  { %44 = dma.hbm_to_vmem [thread:$0]  %s40_s19, 64, %s42_s21, [#allocation8]  }
   0x9   :  { %291 = dma.done.wait [#allocation5], 128  }
   0xa   :  { %292 = vsyncadd [#allocation5], 4294967168 }
   0xb   :  { %293 = dma.done.wait [#allocation8], 64  }
   0xc   :  { %294 = vsyncadd [#allocation8], 4294967232  ;;  %v66_v0 = vld [vmem:[#allocation4] sm:$0xff]  ;;  %v67_v4 = vld [vmem:[#allocation7] sm:$0xf]  ;;  %vm63_vm0 = vcmask 7168  }
   0xd   :  { %69 = vmax.xlane.f32.xlu0 %v66_v0  ;;  %v68_v5 = vunpack.c.l.bf16 %v67_v4  ;;  %v301_v8 = vmov 0.0   ;;  %s302_s0 = smov [#allocation9]   ;;  %s149_s24 = sshll.u32 %s344_s2, 4  ;;  %vm127_vm5 = vcmask 0   ;;  %s150_s24 = int_to_ptr.hbm [resolvable:$true] %s149_s24 }
   0xe   :  { %64 = vst.msk [vmem:[#allocation2] sm:$0xff] %vm63_vm0, %v301_v8  ;;  %s147_s1 = sshll.u32 %s302_s0, 4  ;;  %s303_s25 = smov [#allocation10]   ;;  %s148_s1 = int_to_ptr.vmem [resolvable:$true] %s147_s1 }
   0xf   :  { %65 = vst.msk [vmem:[#allocation3] sm:$0xff] %vm63_vm0, %v301_v8  ;;  %s158_s26 = sshll.u32 %s303_s25, 4  ;;  %s160_s29 = sshll.u32 %s345_s3, 4  ;;  %s159_s26 = int_to_ptr.vmem [resolvable:$true] %s158_s26  ;;  %s161_s29 = int_to_ptr.hbm [resolvable:$true] %s160_s29 }
  0x15   :  { %v103_v25 = vld [vmem:[#allocation2] sm:$0xff] }
  0x16   :  { %v108_v21 = vld [vmem:[#allocation3] sm:$0xff] }
  0x80   :  { %v70_v1 = vpop.xlane.xlu0 %69 }
  0x81   :  { %v71_v2 = vsub.f32 %v66_v0, %v70_v1 }
  0x83   :  { %v72_v3 = vmul.f32 1.442695, %v71_v2 }
  0x85   :  { %189 = vpow2.f32 %v72_v3 }
  0x8b   :  { %v190_v6 = vpop.eup %189 }
  0x8c   :  { %74 = vadd.xlane.f32.xlu0 %v190_v6  ;;  %v76_v7 = vmul.f32 %v190_v6, %v68_v5 }
  0x8e   :  { %77 = vadd.xlane.f32.xlu1 %v76_v7 }
  0xff   :  { %v75_v9 = vpop.xlane.xlu0 %74 }
 0x100   :  { %191 = vrcp.f32 %v75_v9  ;;  %v90_v13 = vand.u32 2147483648, %v75_v9  ;;  %v88_v15 = vand.u32 2147483647, %v75_v9  ;;  %vm84_vm2 = vweird.f32 %v75_v9 }
 0x101   :  { %v78_v20 = vpop.xlane.xlu1 %77 }
 0x102   :  { %v91_v17 = vor.u32 1.1754944e-38, %v90_v13  ;;  %vm89_vm4 = vcmp.eq.f32.partialorder %v88_v15, 8.507059e+37 }
 0x106   :  { %v192_v10 = vpop.eup %191 }
 0x107   :  { %v80_v11 = vmul.f32 %v192_v10, %v75_v9  ;;  %vm85_vm1 = vweird.f32 %v192_v10 }
 0x108   :  { %vm86_vm3 = vmor %vm84_vm2, %vm85_vm1 }
 0x109   :  { %v81_v12 = vsub.f32 1.0, %v80_v11 }
 0x10b   :  { %v82_v14 = vmul.f32 %v192_v10, %v81_v12 }
 0x10d   :  { %v83_v16 = vadd.f32 %v192_v10, %v82_v14 }
 0x10f   :  { %v87_v18 = vsel %vm86_vm3, %v192_v10, %v83_v16 }
 0x110   :  { %v92_v19 = vsel %vm89_vm4, %v91_v17, %v87_v18 }
 0x111   :  { %v93_v22 = vmul.f32 %v92_v19, %v78_v20 }
 0x113   :  { %193 = vlog2.f32 %v93_v22  ;;  %v110_v23 = vadd.f32 %v108_v21, %v93_v22 }
 0x115   :  { %111 = vst.msk [vmem:[#allocation3] sm:$0xff] %vm63_vm0, %v110_v23 }
 0x119   :  { %v194_v24 = vpop.eup %193 }
 0x11a   :  { %v95_v26 = vmul.f32 0.6931472, %v194_v24 }
 0x11c   :  { %v105_v27 = vadd.f32 %v103_v25, %v95_v26  ;;  %v129_v28 = vld [vmem:[#allocation3] sm:$0xff] }
 0x11d   :  { %v130_v29 = vsel %vm63_vm0, %v129_v28, 0.0 }
 0x11e   :  { %107 = vst.msk [vmem:[#allocation2] sm:$0xff] %vm63_vm0, %v105_v27  ;;  %131 = vadd.xlane.f32.xlu2 %v130_v29 }
 0x125   :  { %v115_v30 = vld [vmem:[#allocation2] sm:$0xff] }
 0x126   :  { %v116_v31 = vsel %vm63_vm0, %v115_v30, 0.0 }
 0x127   :  { %117 = vadd.xlane.f32.xlu1 %v116_v31 }
 0x191   :  { %v132_v32 = vpop.xlane.xlu2 %131 }
 0x192   :  { %v133_v33 = vrot.slane %v132_v32, 4 }
 0x194   :  { %v134_v34 = vadd.f32 %v133_v33, %v132_v32 }
 0x196   :  { %v135_v35 = vrot.slane %v134_v34, 2 }
 0x198   :  { %v136_v39 = vadd.f32 %v135_v35, %v134_v34 }
 0x19a   :  { %v118_v36 = vpop.xlane.xlu1 %117  ;;  %v137_v42 = vrot.slane %v136_v39, 1 }
 0x19b   :  { %v119_v37 = vrot.slane %v118_v36, 4 }
 0x19c   :  { %v138_v45 = vadd.f32 %v137_v42, %v136_v39 }
 0x19d   :  { %v120_v38 = vadd.f32 %v119_v37, %v118_v36 }
 0x19f   :  { %v121_v40 = vrot.slane %v120_v38, 2 }
 0x1a1   :  { %v122_v41 = vadd.f32 %v121_v40, %v120_v38 }
 0x1a3   :  { %v123_v43 = vrot.slane %v122_v41, 1 }
 0x1a5   :  { %v124_v44 = vadd.f32 %v123_v43, %v122_v41 }
 0x1a7   :  { %180 = vpush %v124_v44 }
 0x1a8   :  { %182 = vpush %v138_v45 }
 0x1d8   :  { %s181_s30 = spop %180 }
 0x1d9   :  { %v126_v46 = vstv %s181_s30  ;;  %s183_s4 = spop %182 }
 0x1da   :  { %128 = vst.msk [vmem:[#allocation9] sm:$0x1] %vm127_vm5, %v126_v46  ;;  %v140_v47 = vstv %s183_s4 }
 0x1db   :  { %141 = vst.msk [vmem:[#allocation10] sm:$0x1] %vm127_vm5, %v140_v47  ;;  %152 = dma.vmem_to_hbm [thread:$0]  %s148_s1, 16, %s150_s24, [#allocation6]  }
 0x1dc   :  { %163 = dma.vmem_to_hbm [thread:$0]  %s159_s26, 16, %s161_s29, [#allocation11]  }
 0x1dd   :  { %295 = dma.done.wait [#allocation6], 16  }
 0x1de   :  { %296 = vsyncadd [#allocation6], 4294967280 }
 0x1df   :  { %297 = dma.done.wait [#allocation11], 16  }
 0x1e0   :  { %298 = vsyncadd [#allocation11], 4294967280 }
 0x1e1   :  { %172 = vsyncpa [#allocation5], 1 }
 0x1e2   :  { %173 = vsyncpa [#allocation8], 1 }
 0x1e3   :  { %174 = vsyncpa [#allocation6], 1 }
 0x1e4   :  { %175 = vsyncpa [#allocation11], 1 }

</bundles_post_ra>
